<compile_context>
chip_gen: v5e
topology: v5e:2x2
jax: 0.10.0
libtpu: 0.0.40
codegen_flags: <defaults>
</compile_context>

<pallas_src>
import numpy as np
import jax
import jax.numpy as jnp
from jax.experimental import pallas as pl
from jax.experimental.pallas import tpu as pltpu


# ---------------------------------------------------------------------------
# Tiling constants
# ---------------------------------------------------------------------------
LANE = 512                 # packed-buffer lane width (multiple of 128)
MAX_TILE_ROWS = 1024       # up to 1024 x 512 f32 = 2 MiB per input block


def _detect_ncores():
    """2-way 'parallel' row split only on chips with 2 TensorCores (v7x).
    v5e / v6e have a single TC, where an extra grid axis only doubles the
    number of (serial) grid steps."""
    try:
        kind = str(jax.devices()[0].device_kind).lower()
    except Exception:
        return 1
    return 2 if ("v7" in kind or "tpu7" in kind) else 1


def _pick_tile_rows(data_rows, ncores):
    """Largest power-of-two tile (rows of LANE elements) in [8*ncores, 1024]
    that still leaves >= ~4 grid steps, so tiny inputs keep tiny tiles (little
    segment-boundary padding) and big inputs get ~2 MiB blocks."""
    tr = 8 * ncores
    while tr < MAX_TILE_ROWS and tr * 4 <= max(int(data_rows), 1):
        tr *= 2
    return tr


# ---------------------------------------------------------------------------
# Fused Pallas kernel: per-segment sum( w_row * |a - b| )
# ---------------------------------------------------------------------------

def _weighted_absdiff_segsum_kernel(seg_ids_ref, a_ref, b_ref, w_ref,
                                    o_ref, acc_ref):
    t = pl.program_id(1)
    nt = pl.num_programs(1)
    sid = seg_ids_ref[t]
    prev_sid = seg_ids_ref[jnp.maximum(t - 1, 0)]
    next_sid = seg_ids_ref[jnp.minimum(t + 1, nt - 1)]
    is_first = jnp.logical_or(t == 0, sid != prev_sid)
    is_last = jnp.logical_or(t == nt - 1, sid != next_sid)

    @pl.when(is_first)
    def _():
        acc_ref[...] = jnp.zeros_like(acc_ref)

    a = a_ref[...].astype(jnp.float32)
    b = b_ref[...].astype(jnp.float32)
    w = w_ref[...]                              # (rows, 1) f32; lane broadcast
    contrib = jnp.abs(a - b) * w                # pure VPU

    rows, lane = contrib.shape                  # static block shape
    # Fold sublane-row groups into the small (8, LANE) accumulator:
    # pure vreg adds in the hot loop, no cross-lane (XLU) work, tiny vst traffic.
    acc_ref[...] += jnp.sum(contrib.reshape(rows // 8, 8, lane), axis=0)

    @pl.when(is_last)
    def _():
        # One cross-lane reduce per segment; lane-dense (8,128) output slab.
        o_ref[...] = jnp.broadcast_to(jnp.sum(acc_ref[...]), o_ref.shape)


# ---------------------------------------------------------------------------
# Packing helpers (JAX / host glue)
# ---------------------------------------------------------------------------

def _float_dtype(tensors):
    dt = jnp.result_type(*[jnp.asarray(t).dtype for t in tensors])
    return dt if jnp.issubdtype(dt, jnp.floating) else jnp.float32


def _pair_rows(pair):
    n = int(jnp.asarray(pair[0]).size)
    return max(1, -(-n // LANE))


def _pack_group(pairs, dtype, tile_rows):
    """Pack one output segment: flatten each (a, b) pair to LANE-wide rows,
    build a per-row weight = 1/N(pair), pad the group to a whole number of
    grid tiles with zero rows (weight 0, data 0 -> contributes nothing)."""
    a_chunks, b_chunks, w_chunks = [], [], []
    n_rows = 0
    for a, b in pairs:
        a = jnp.asarray(a)
        b = jnp.asarray(b)
        assert a.size == b.size, (a.shape, b.shape)
        n = int(a.size)
        rows = max(1, -(-n // LANE))
        pad = rows * LANE - n
        af = jnp.ravel(a).astype(dtype)
        bf = jnp.ravel(b).astype(dtype)
        if pad:
            af = jnp.pad(af, (0, pad))          # pads with 0: |0-0| == 0
            bf = jnp.pad(bf, (0, pad))
        a_chunks.append(af)
        b_chunks.append(bf)
        w_chunks.append(np.full((rows,), 1.0 / float(n), dtype=np.float32))
        n_rows += rows

    grp_rows = -(-n_rows // tile_rows) * tile_rows
    pad_rows = grp_rows - n_rows
    if pad_rows:
        a_chunks.append(jnp.zeros((pad_rows * LANE,), dtype))
        b_chunks.append(jnp.zeros((pad_rows * LANE,), dtype))
        w_chunks.append(np.zeros((pad_rows,), np.float32))

    a_rows = jnp.concatenate(a_chunks).reshape(grp_rows, LANE)
    b_rows = jnp.concatenate(b_chunks).reshape(grp_rows, LANE)
    w_rows = jnp.asarray(np.concatenate(w_chunks).reshape(grp_rows, 1))
    return a_rows, b_rows, w_rows


# ---------------------------------------------------------------------------
# Fused reduction wrapper
# ---------------------------------------------------------------------------

def fused_weighted_absdiff(feat_pairs, mel_pair):
    """Returns (sum over feat pairs of mean|a-b|, mean|real_mel - fake_mel|)
    using a single pallas_call with two output segments."""
    groups = []
    if feat_pairs:
        groups.append(list(feat_pairs))
    groups.append([mel_pair])

    all_tensors = [t for g in groups for p in g for t in p]
    dtype = _float_dtype(all_tensors)           # keep bf16 packed, upcast in-kernel

    ncores = _detect_ncores()
    data_rows = sum(_pair_rows(p) for g in groups for p in g)
    tile_rows = _pick_tile_rows(data_rows, ncores)
    assert tile_rows % (8 * ncores) == 0
    rows_per_core = tile_rows // ncores

    a_parts, b_parts, w_parts, seg_ids = [], [], [], []
    for sid, g in enumerate(groups):
        a_rows, b_rows, w_rows = _pack_group(g, dtype, tile_rows)
        a_parts.append(a_rows)
        b_parts.append(b_rows)
        w_parts.append(w_rows)
        seg_ids.append(np.full((a_rows.shape[0] // tile_rows,), sid, np.int32))

    abuf = jnp.concatenate(a_parts, axis=0)
    bbuf = jnp.concatenate(b_parts, axis=0)
    wbuf = jnp.concatenate(w_parts, axis=0)
    seg_ids = np.concatenate(seg_ids)
    num_seg = len(groups)
    num_tiles = int(seg_ids.shape[0])

    # Each grid tile t = ncores contiguous row-blocks; core c takes row-block
    # t*ncores + c (contiguous, full 512-lane width per core).
    out = pl.pallas_call(
        _weighted_absdiff_segsum_kernel,
        out_shape=jax.ShapeDtypeStruct((ncores, num_seg, 8, 128), jnp.float32),
        grid_spec=pltpu.PrefetchScalarGridSpec(
            num_scalar_prefetch=1,
            grid=(ncores, num_tiles),
            in_specs=[
                pl.BlockSpec((rows_per_core, LANE),
                             lambda c, t, seg: (t * ncores + c, 0)),
                pl.BlockSpec((rows_per_core, LANE),
                             lambda c, t, seg: (t * ncores + c, 0)),
                pl.BlockSpec((rows_per_core, 1),
                             lambda c, t, seg: (t * ncores + c, 0)),
            ],
            out_specs=pl.BlockSpec((1, 1, 8, 128),
                                   lambda c, t, seg: (c, seg[t], 0, 0)),
            scratch_shapes=[pltpu.VMEM((8, LANE), jnp.float32)],
        ),
        compiler_params=pltpu.CompilerParams(
            # TODO(synk): try pltpu.CORE_PARALLEL on v7x if "parallel" does not
            # shard the leading axis across the two TensorCores.
            dimension_semantics=("parallel", "arbitrary"),
            vmem_limit_bytes=32 * 1024 * 1024,   # worst case ~10 MiB per step
        ),
    )(jnp.asarray(seg_ids), abuf, bbuf, wbuf)

    per_seg = out[:, :, 0, 0].sum(axis=0)        # add per-core partials
    if feat_pairs:
        return per_seg[0], per_seg[1]
    return jnp.float32(0.0), per_seg[0]


# ---------------------------------------------------------------------------
# Loss composition (mirrors the PyTorch module exactly)
# ---------------------------------------------------------------------------

def generator_loss_forward(ans_fp, ans_fs, feat_tp, feat_fp, feat_ts, feat_fs,
                           real_mel, fake_mel, **batch):
    # --- adversarial loss: tiny tensors -> plain XLA (per perf review) ---
    g_loss = jnp.float32(0.0)
    for x in list(ans_fp) + list(ans_fs):
        x = jnp.asarray(x).astype(jnp.float32)
        g_loss = g_loss + jnp.mean((1.0 - x) ** 2)

    # --- feature-matching + mel L1: one fused Pallas kernel ---
    feat_pairs = []
    for ft, ff in zip(feat_tp, feat_fp):
        for t, f in zip(ft, ff):
            feat_pairs.append((f, t))
    for ft, ff in zip(feat_ts, feat_fs):
        for t, f in zip(ft, ff):
            feat_pairs.append((f, t))

    feat_mean_sum, l1_mean = fused_weighted_absdiff(feat_pairs,
                                                    (real_mel, fake_mel))
    f_loss = 2.0 * feat_mean_sum
    l1_loss = 45.0 * l1_mean

    return {
        'gen_loss': g_loss + f_loss + l1_loss,
        'g_loss': g_loss,
        'feat_loss': f_loss,
        'l1_loss': l1_loss,
    }


# ---------------------------------------------------------------------------
# Pure JAX reference (sanity check)
# ---------------------------------------------------------------------------

def _ref_forward(ans_fp, ans_fs, feat_tp, feat_fp, feat_ts, feat_fs,
                 real_mel, fake_mel):
    def ref_gen(disc_class):
        return sum(jnp.mean((1.0 - o.astype(jnp.float32)) ** 2)
                   for o in disc_class)

    def ref_feat(ft_list, ff_list):
        l = jnp.float32(0.0)
        for ft, ff in zip(ft_list, ff_list):
            for t, f in zip(ft, ff):
                l = l + jnp.mean(jnp.abs(f.astype(jnp.float32)
                                         - t.astype(jnp.float32)))
        return 2.0 * l

    g = ref_gen(ans_fp) + ref_gen(ans_fs)
    f = ref_feat(feat_tp, feat_fp) + ref_feat(feat_ts, feat_fs)
    l1 = jnp.mean(jnp.abs(real_mel.astype(jnp.float32)
                          - fake_mel.astype(jnp.float32))) * 45.0
    return {'gen_loss': g + f + l1, 'g_loss': g, 'feat_loss': f, 'l1_loss': l1}


# ---------------------------------------------------------------------------
# Main
# ---------------------------------------------------------------------------

if __name__ == "__main__":
    key = jax.random.PRNGKey(0)

    def nxt():
        global key
        key, sub = jax.random.split(key)
        return sub

    # Synthetic discriminator outputs (MPD-like "ans_fp", MSD-like "ans_fs").
    ans_fp = [jax.random.normal(nxt(), (2, 1, 16), jnp.float32),
              jax.random.normal(nxt(), (2, 1, 32), jnp.float32)]
    ans_fs = [jax.random.normal(nxt(), (2, 1, 24), jnp.float32),
              jax.random.normal(nxt(), (2, 1, 48), jnp.float32)]

    # Feature maps: per sub-discriminator, a list of layer activations.
    def make_feats(shapes):
        return [[jax.random.normal(nxt(), s, jnp.float32) for s in shapes]
                for _ in range(2)]

    fp_shapes = [(2, 4, 16), (2, 8, 8)]
    fs_shapes = [(2, 4, 32), (2, 8, 16)]
    feat_tp = make_feats(fp_shapes)
    feat_fp = make_feats(fp_shapes)
    feat_ts = make_feats(fs_shapes)
    feat_fs = make_feats(fs_shapes)

    # Mel spectrograms: (batch, n_mels, frames)
    real_mel = jax.random.normal(nxt(), (2, 16, 32), jnp.float32)
    fake_mel = jax.random.normal(nxt(), (2, 16, 32), jnp.float32)

    losses = generator_loss_forward(ans_fp, ans_fs, feat_tp, feat_fp,
                                    feat_ts, feat_fs, real_mel, fake_mel)
    losses = {k: jax.block_until_ready(v) for k, v in losses.items()}

    ref = _ref_forward(ans_fp, ans_fs, feat_tp, feat_fp, feat_ts, feat_fs,
                       real_mel, fake_mel)
    for k in losses:
        assert jnp.allclose(losses[k], ref[k], rtol=1e-5, atol=1e-5), (
            k, losses[k], ref[k])

    print("KERNEL_OK")
</pallas_src>

<mosaic_0001>
module attributes {stable_mosaic.version = 11 : i64} {
  func.func @_weighted_absdiff_segsum_kernel(%arg0: i32, %arg1: i32, %arg2: memref<2xi32, #tpu.memory_space<smem>>, %arg3: memref<8x512xf32, #tpu.memory_space<vmem>>, %arg4: memref<8x512xf32, #tpu.memory_space<vmem>>, %arg5: memref<8x1xf32, #tpu.memory_space<vmem>>, %arg6: memref<1x1x8x128xf32, #tpu.memory_space<vmem>>, %arg7: memref<8x512xf32, #tpu.memory_space<vmem>>) attributes {dimension_semantics = [#tpu.dimension_semantics<parallel>, #tpu.dimension_semantics<arbitrary>], iteration_bounds = array<i64: 1, 2>, scalar_prefetch = 1 : i64, scratch_operands = 1 : i64, tpu.core_type = #tpu.core_type<tc>, window_params = [{transform_indices = @transform_0, window_bounds = array<i64: 8, 512>}, {transform_indices = @transform_1, window_bounds = array<i64: 8, 512>}, {transform_indices = @transform_2, window_bounds = array<i64: 8, 1>}, {transform_indices = @transform_3, window_bounds = array<i64: 1, 1, 8, 128>}]} {
    %0 = arith.index_cast %arg1 : i32 to index
    %1 = memref.load %arg2[%0] : memref<2xi32, #tpu.memory_space<smem>>
    %c1_i32 = arith.constant 1 : i32
    %2 = arith.subi %arg1, %c1_i32 : i32
    %c0_i32 = arith.constant 0 : i32
    %3 = arith.maxsi %2, %c0_i32 : i32
    %4 = arith.index_cast %3 : i32 to index
    %5 = memref.load %arg2[%4] : memref<2xi32, #tpu.memory_space<smem>>
    %c1_i32_0 = arith.constant 1 : i32
    %6 = arith.addi %arg1, %c1_i32_0 : i32
    %c1_i32_1 = arith.constant 1 : i32
    %7 = arith.minsi %6, %c1_i32_1 : i32
    %8 = arith.index_cast %7 : i32 to index
    %9 = memref.load %arg2[%8] : memref<2xi32, #tpu.memory_space<smem>>
    %c0_i32_2 = arith.constant 0 : i32
    %10 = arith.cmpi eq, %arg1, %c0_i32_2 : i32
    %11 = arith.cmpi ne, %1, %5 : i32
    %12 = arith.ori %10, %11 : i1
    %c1_i32_3 = arith.constant 1 : i32
    %13 = arith.cmpi eq, %arg1, %c1_i32_3 : i32
    %14 = arith.cmpi ne, %1, %9 : i32
    %15 = arith.ori %13, %14 : i1
    %16 = arith.extui %12 : i1 to i32
    %c0_i32_4 = arith.constant 0 : i32
    %17 = arith.cmpi ne, %16, %c0_i32_4 : i32
    scf.if %17 {
      %cst_15 = arith.constant 0.000000e+00 : f32
      %32 = vector.broadcast %cst_15 : f32 to vector<8x512xf32>
      %c0_16 = arith.constant 0 : index
      %c0_17 = arith.constant 0 : index
      %33 = vector.load %arg7[%c0_16, %c0_17] : memref<8x512xf32, #tpu.memory_space<vmem>>, vector<8x512xf32>
      tpu.vector_store %arg7[%c0_16, %c0_17], %32 {strides = array<i32>} : memref<8x512xf32, #tpu.memory_space<vmem>>, vector<8x512xf32>,
    } else {
    }
    %c0 = arith.constant 0 : index
    %c0_5 = arith.constant 0 : index
    %18 = vector.load %arg3[%c0, %c0_5] : memref<8x512xf32, #tpu.memory_space<vmem>>, vector<8x512xf32>
    %c0_6 = arith.constant 0 : index
    %c0_7 = arith.constant 0 : index
    %19 = vector.load %arg4[%c0_6, %c0_7] : memref<8x512xf32, #tpu.memory_space<vmem>>, vector<8x512xf32>
    %c0_8 = arith.constant 0 : index
    %c0_9 = arith.constant 0 : index
    %20 = vector.load %arg5[%c0_8, %c0_9] : memref<8x1xf32, #tpu.memory_space<vmem>>, vector<8x1xf32>
    %21 = arith.subf %18, %19 : vector<8x512xf32>
    %22 = math.absf %21 : vector<8x512xf32>
    %23 = vector.broadcast %20 : vector<8x1xf32> to vector<8x512xf32>
    %24 = arith.mulf %22, %23 : vector<8x512xf32>
    %c0_10 = arith.constant 0 : index
    %c0_11 = arith.constant 0 : index
    %25 = vector.load %arg7[%c0_10, %c0_11] : memref<8x512xf32, #tpu.memory_space<vmem>>, vector<8x512xf32>
    %26 = vector.shape_cast %24 : vector<8x512xf32> to vector<1x8x512xf32>
    %cst = arith.constant dense<0.000000e+00> : vector<8x512xf32>
    %27 = vector.multi_reduction <add>, %26, %cst [0] : vector<1x8x512xf32> to vector<8x512xf32>
    %28 = arith.addf %25, %27 : vector<8x512xf32>
    %c0_12 = arith.constant 0 : index
    %c0_13 = arith.constant 0 : index
    %29 = vector.load %arg7[%c0_12, %c0_13] : memref<8x512xf32, #tpu.memory_space<vmem>>, vector<8x512xf32>
    tpu.vector_store %arg7[%c0_12, %c0_13], %28 {strides = array<i32>} : memref<8x512xf32, #tpu.memory_space<vmem>>, vector<8x512xf32>,
    %30 = arith.extui %15 : i1 to i32
    %c0_i32_14 = arith.constant 0 : i32
    %31 = arith.cmpi ne, %30, %c0_i32_14 : i32
    scf.if %31 {
      %c0_15 = arith.constant 0 : index
      %c0_16 = arith.constant 0 : index
      %32 = vector.load %arg7[%c0_15, %c0_16] : memref<8x512xf32, #tpu.memory_space<vmem>>, vector<8x512xf32>
      %33 = vector.shape_cast %32 : vector<8x512xf32> to vector<1x8x512xf32>
      %cst_17 = arith.constant dense<0.000000e+00> : vector<1xf32>
      %34 = vector.multi_reduction <add>, %33, %cst_17 [1, 2] : vector<1x8x512xf32> to vector<1xf32>
      %35 = vector.shape_cast %34 : vector<1xf32> to vector<1x1x1xf32>
      %36 = vector.extract %35[0, 0, 0] : f32 from vector<1x1x1xf32>
      %37 = vector.broadcast %36 : f32 to vector<1x1x8x128xf32>
      %c0_18 = arith.constant 0 : index
      %c0_19 = arith.constant 0 : index
      %c0_20 = arith.constant 0 : index
      %c0_21 = arith.constant 0 : index
      %38 = vector.load %arg6[%c0_18, %c0_19, %c0_20, %c0_21] : memref<1x1x8x128xf32, #tpu.memory_space<vmem>>, vector<1x1x8x128xf32>
      tpu.vector_store %arg6[%c0_18, %c0_19, %c0_20, %c0_21], %37 {strides = array<i32>} : memref<1x1x8x128xf32, #tpu.memory_space<vmem>>, vector<1x1x8x128xf32>,
    } else {
    }
    return
  }
  func.func @transform_0(%arg0: i32, %arg1: i32, %arg2: memref<2xi32, #tpu.memory_space<smem>>) -> (i32, i32) {
    %c1_i32 = arith.constant 1 : i32
    %0 = arith.muli %arg1, %c1_i32 : i32
    %1 = arith.addi %0, %arg0 : i32
    %c0_i32 = arith.constant 0 : i32
    %c0_i32_0 = arith.constant 0 : i32
    return %1, %c0_i32 : i32, i32
  }
  func.func @transform_1(%arg0: i32, %arg1: i32, %arg2: memref<2xi32, #tpu.memory_space<smem>>) -> (i32, i32) {
    %c1_i32 = arith.constant 1 : i32
    %0 = arith.muli %arg1, %c1_i32 : i32
    %1 = arith.addi %0, %arg0 : i32
    %c0_i32 = arith.constant 0 : i32
    %c0_i32_0 = arith.constant 0 : i32
    return %1, %c0_i32 : i32, i32
  }
  func.func @transform_2(%arg0: i32, %arg1: i32, %arg2: memref<2xi32, #tpu.memory_space<smem>>) -> (i32, i32) {
    %c1_i32 = arith.constant 1 : i32
    %0 = arith.muli %arg1, %c1_i32 : i32
    %1 = arith.addi %0, %arg0 : i32
    %c0_i32 = arith.constant 0 : i32
    %c0_i32_0 = arith.constant 0 : i32
    return %1, %c0_i32 : i32, i32
  }
  func.func @transform_3(%arg0: i32, %arg1: i32, %arg2: memref<2xi32, #tpu.memory_space<smem>>) -> (i32, i32, i32, i32) {
    %0 = arith.index_cast %arg1 : i32 to index
    %1 = memref.load %arg2[%0] : memref<2xi32, #tpu.memory_space<smem>>
    %c0_i32 = arith.constant 0 : i32
    %c0_i32_0 = arith.constant 0 : i32
    %c0_i32_1 = arith.constant 0 : i32
    return %arg0, %1, %c0_i32, %c0_i32_0 : i32, i32, i32, i32
  }
}

</mosaic_0001>

<bundles_post_ra>
// kernel: tpu_custom_call.1
= control target key start
LH: loop header
LB: loop body
LE: loop exit
PB: predicated region body
PF: predicated region fallthrough
CT: control target
= control target key end

     0   :  { %s815_s18 = smov [#allocation4]   ;;  %s1045_s0 = inlined_call_operand.vmem [shape: s32[2], index: 0, kind: input, shape index: {}]   ;;  %s1046_s1 = inlined_call_operand.hbm [shape: f32[16,512], index: 1, kind: input, shape index: {}]   ;;  %s1047_s2 = inlined_call_operand.hbm [shape: f32[16,512], index: 2, kind: input, shape index: {}]   ;;  %s1048_s3 = inlined_call_operand.vmem [shape: f32[16,1], index: 3, kind: input, shape index: {}]   ;;  %s1049_s4 = inlined_call_operand.hbm [shape: f32[1,2,8,128], index: 4, kind: output, shape index: {}]  }
   0x1   :  { %1052 = sst [smem:[#allocation19_spill]] %s1046_s1  ;;  %s10_s17 = sshll.u32 %s1045_s0, 4  ;;  %s11_s17 = int_to_ptr.vmem [resolvable:$true] %s10_s17 }
   0x2   :  { %13 = dma.vmem_to_smem %s11_s17, 16, %s815_s18, [#allocation3] }
   0x3   :  { %765 = dma.done.wait [#allocation3], 16 }
   0x4   :  { %766 = vsyncadd [#allocation3], 4294967280 }
   0x5   :  { %16 = sfence }
   0x6   :  { %17 = vsyncpa [#allocation6], 0 }
   0x7   :  { %19 = vsyncpa [#allocation6 + $0x1], 0 }
   0x8   :  { %20 = vsyncpa [#allocation9], 0 }
   0x9   :  { %22 = vsyncpa [#allocation9 + $0x1], 0 }
   0xa   :  { %23 = vsyncpa [#allocation7], 0 }
   0xb   :  { %25 = vsyncpa [#allocation7 + $0x1], 0  ;;  %s846_s19 = smov 0   ;;  %s848_s20 = smov 0  }
   0xc   :  { %s850_s21 = smov 0   ;;  %s852_s22 = smov 0  }
   0xd   :  { %s854_s0 = smov 0   ;;  %s856_s23 = smov 0  }
   0xe   :  { %s858_s24 = smov 0   ;;  %s860_s25 = smov 0  }
   0xf   :  { %s862_s26 = smov 0  }
  0x10 LB: > { %1053 = sst [smem:[#allocation16_spill]] %s809_s25  ;;  %s508_s27 = sadd.s32 4294967295, %s813_s26   ;;  %s813_s26 = sphi %s862_s26, %s31_s26   ;;  %s809_s25 = sphi %s860_s25, %s1064_s25   ;;  %s805_s24 = sphi %s858_s24, %s1063_s24   ;;  %s801_s23 = sphi %s856_s23, %s1070_s23   ;;  %s797_s0 = sphi %s854_s0, %s1069_s0   ;;  %s793_s22 = sphi %s852_s22, %s1068_s22   ;;  %s789_s21 = sphi %s850_s21, %s1067_s21   ;;  %s785_s20 = sphi %s848_s20, %s1066_s20   ;;  %s781_s19 = sphi %s846_s19, %s1065_s19  }
  0x11   : > { %s509_s28 = sadd.s32 4294967294, %s813_s26   ;;  %s40_s29 = sadd.s32 1, %s809_s25 }
  0x12   : > { %s52_s30 = sadd.s32 1, %s801_s23  ;;  %p41_p0 = scmp.ge.s32.totalorder %s40_s29, 2 }
  0x13   : > { %p59_p1 = scmp.ne.s32.totalorder %s801_s23, %s797_s0  ;;  %p60_p2 = scmp.eq.s32.totalorder %s813_s26, 0 }
  0x14   : > { %p65_p3 = scmp.ne.s32.totalorder %s797_s0, %s793_s22  ;;  %s1072_s29 = smov (%p41_p0, %s40_s29), 0 }
  0x15   : > { %1054 = sst [smem:[#allocation17_spill]] %s1072_s29  ;;  %p899_p4 = por %p60_p2, %p59_p1 }
  0x16   : > { %p66_p5 = scmp.eq.s32.totalorder %s508_s27, 0  ;;  %s49_s6 = ssub.s32 %s809_s25, %s1072_s29 }
  0x17   : > { %s131_s7 = sld [smem:[#allocation4 + %s809_s25]]  ;;  %p50_p6 = scmp.eq.s32.totalorder %s49_s6, 0 }
  0x18   : > { %p906_p7 = por %p66_p5, %p65_p3  ;;  %s132_s9 = sld [smem:[#allocation4 + %s1072_s29]] }
  0x19   : > { %s138_s10 = sadd.s32 1, %s789_s21  ;;  %p148_p8 = scmp.ne.s32.totalorder %s789_s21, %s785_s20 }
  0x1a   : > { %s913_s11 = scalar_select %p50_p6, %s801_s23, %s52_s30  }
  0x1b   : > { %p149_p9 = scmp.eq.s32.totalorder %s508_s27, 1  ;;  %p154_p10 = scmp.ne.s32.totalorder %s785_s20, %s781_s19 }
  0x1c   : > { %1057 = sst [smem:[#allocation18_spill]] %s913_s11  ;;  %p155_p11 = scmp.eq.s32.totalorder %s509_s28, 1 }
  0x1d   : > { %p919_p12 = por %p149_p9, %p148_p8  ;;  %p511_p13 = scmp.ge.s32.totalorder %s813_s26, 2 }
  0x1e   : > { %p924_p0 = por %p155_p11, %p154_p10  ;;  %p551_p1 = scmp.lt.s32.totalorder %s813_s26, 2 }
  0x1f   : > { %s134_s14 = ssub.s32 %s131_s7, %s132_s9  ;;  %s175_s15 = sand.u32 1, %s801_s23  }
  0x20   : > { %p136_p2 = scmp.eq.s32.totalorder %s134_s14, 0  ;;  %s512_s16 = sshll.u32 %s175_s15, 5 }
  0x21   : > { %s528_s17 = sshll.u32 %s809_s25, 5  ;;  %s1060_s1 = sld [smem:[#allocation19_spill]] }
  0x22   : > { %s932_s18 = scalar_select %p136_p2, %s789_s21, %s138_s10  }
  0x23   : > { %s179_s6 = scalar_lea.vmem [#allocation5], %s512_s16  ;;  %p541_p3 = pnand %p551_p1, %p899_p4 }
  0x24   : > { %s189_s29 = sshll.u32 %s179_s6, 4  ;;  %p518_p5 = scmp.ge.s32.totalorder %s813_s26, 1  ;;  %s190_s29 = int_to_ptr.vmem [resolvable:$true] %s189_s29 }
  0x25   : > { %p224_p6 = scmp.lt.s32.totalorder %s813_s26, 3  ;;  %s176_s7 = scalar_lea.sflag [#allocation6], %s175_s15 }
  0x26   : > { %s206_s14 = scalar_lea.hbm %s1047_s2, %s528_s17  ;;  %s200_s22 = scalar_lea.vmem [#allocation8], %s512_s16 }
  0x27   : > { %s185_s28 = scalar_lea.hbm %s1060_s1, %s528_s17  ;;  %p225_p8 = pnand %p518_p5, %p224_p6 }
  0x28   : > { %s187_s30 = sshll.u32 %s185_s28, 4  ;;  %s208_s25 = sshll.u32 %s206_s14, 4  ;;  %s188_s30 = int_to_ptr.hbm [resolvable:$true] %s187_s30  ;;  %s209_s25 = int_to_ptr.hbm [resolvable:$true] %s208_s25 }
  0x29   : > { %543 = dma.hbm_to_vmem [thread:$0]  (!%p541_p3), %s188_s30, 512, %s190_s29, %s176_s7  }
  0x2a   : > { %s210_s27 = sshll.u32 %s200_s22, 4  ;;  %s197_s28 = scalar_lea.sflag [#allocation9], %s175_s15  ;;  %s211_s27 = int_to_ptr.vmem [resolvable:$true] %s210_s27 }
  0x2b   : > { %546 = dma.hbm_to_vmem [thread:$0]  (!%p541_p3), %s209_s25, 512, %s211_s27, %s197_s28  }
  0x2c   : > { %228 = sbr.rel (%p225_p8) target bundleno = 410 (0x19a), region = 32  ;;  %s230_s5 = sand.u32 (!%p225_p8), 1, %s797_s0  }
  0x2d   : > { %s519_s6 = sshll.u32 (!%p225_p8), %s230_s5, 5  ;;  %s231_s1 = scalar_lea.sflag (!%p225_p8), [#allocation6], %s230_s5 }
  0x2e   : > { %s947_s11 = scalar_lea.vmem (!%p225_p8), [#allocation5], %s519_s6 }
  0x31   : > { %768 = dma.done.wait (%p906_p7), %s231_s1, 512  }
  0x32   : > { %770 = vsyncadd (%p906_p7), %s231_s1, 4294966784  ;;  %s241_s29 = scalar_lea.sflag [#allocation9], %s230_s5  ;;  %s953_s16 = scalar_lea.vmem [#allocation8], %s519_s6 }
  0x33   : > { %772 = dma.done.wait (%p906_p7), %s241_s29, 512  }
  0x34   : > { %774 = vsyncadd (%p906_p7), %s241_s29, 4294966784  ;;  %s523_s25 = sadd.s32 4294967295, %s805_s24  ;;  %s292_s1 = sadd.s32 1, %s805_s24 }
  0x35   : > { %p289_p4 = scmp.gt.s32.totalorder %s523_s25, 0  ;;  %s287_s15 = sld [smem:[#allocation4 + %s805_s24]] }
  0x36   : > { %p293_p9 = scmp.lt.s32.totalorder %s292_s1, 1  ;;  %s275_s8 = sand.u32 1, %s785_s20  }
  0x37   : > { %s1074_s25 = smov (!%p289_p4, %s523_s25), 0  ;;  %s965_s7 = sshll.u32 %s275_s8, 3 }
  0x38   : > { %s1076_s1 = smov (!%p293_p9, %s292_s1), 1  ;;  %s291_s17 = sld [smem:[#allocation4 + %s1074_s25]] }
  0x39   : > { %s295_s30 = sld [smem:[#allocation4 + %s1076_s1]]  ;;  %p281_p7 = scmp.lt.s32.totalorder %s805_s24, 1 }
  0x3a   : > { %p296_p10 = scmp.eq.s32.totalorder %s805_s24, 0  ;;  %p299_p11 = scmp.eq.s32.totalorder %s805_s24, 1 }
  0x3b   : > { %s282_s9 = scalar_select %p281_p7, %s805_s24, 1 }
  0x3c   : > { %s277_s5 = scalar_lea.vmem [#allocation10], %s965_s7 }
  0x3d   : > { %s522_s10 = sshll.u32 %s282_s9, 3 }
  0x3e   : > { %p297_p1 = scmp.ne.s32.totalorder %s287_s15, %s291_s17  ;;  %s284_s27 = scalar_lea.vmem %s1048_s3, %s522_s10 }
  0x3f   : > { %p300_p2 = scmp.ne.s32.totalorder %s287_s15, %s295_s30 }
  0x40   : > { %p298_p3 = por %p297_p1, %p296_p10 }
  0x41   : > { %p974_p5 = por %p300_p2, %p299_p11  ;;  %v816_v0 = vmov (%p298_p3), 0.0  }
  0x42   : > { %304 = sbr.rel (!%p298_p3) target bundleno = 71 (0x47), region = 44  ;;  %305 = vst [vmem:[#allocation2 + $0x10] sm:$0xff] (%p298_p3), %v816_v0 }
  0x43   : > { %306 = vst [vmem:[#allocation2] sm:$0xff] (%p298_p3), %v816_v0 }
  0x44   : > { %307 = vst [vmem:[#allocation2 + $0x18] sm:$0xff] (%p298_p3), %v816_v0 }
  0x45   : > { %308 = vst [vmem:[#allocation2 + $0x8] sm:$0xff] (%p298_p3), %v816_v0 }
  0x47 PF: > { %v317_v1 = vld [vmem:[%s284_s27] sm:$0xff]  ;;  %v817_v2 = vmov 0   ;;  %v310_v4 = vld [vmem:[%s947_s11 + $0x8] sm:$0xff]  ;;  %v311_v5 = vld [vmem:[%s947_s11 + $0x10] sm:$0xff] }
  0x48   : > { %628 = vset.pattern.permute.xlu0 %v817_v2  ;;  %v309_v3 = vld [vmem:[%s947_s11] sm:$0xff]  ;;  %v312_v6 = vld [vmem:[%s947_s11 + $0x18] sm:$0xff]  ;;  %v314_v8 = vld [vmem:[%s953_s16 + $0x8] sm:$0xff] }
  0x49   : > { %328 = vperm.xlu0 %628, %v317_v1   ;;  %v313_v7 = vld [vmem:[%s953_s16] sm:$0xff]  ;;  %v315_v9 = vld [vmem:[%s953_s16 + $0x10] sm:$0xff]  ;;  %v316_v10 = vld [vmem:[%s953_s16 + $0x18] sm:$0xff]  ;;  %v319_v12 = vsub.f32 %v310_v4, %v314_v8 }
  0x4a   : > { %v318_v11 = vsub.f32 %v309_v3, %v313_v7  ;;  %v320_v13 = vsub.f32 %v311_v5, %v315_v9  ;;  %v321_v14 = vsub.f32 %v312_v6, %v316_v10  ;;  %v335_v19 = vld [vmem:[#allocation2 + $0x10] sm:$0xff]  ;;  %v336_v20 = vld [vmem:[#allocation2] sm:$0xff] }
  0x4b   : > { %v323_v16 = vand.u32 2147483647, %v319_v12  ;;  %v337_v21 = vld [vmem:[#allocation2 + $0x18] sm:$0xff] }
  0x4c   : > { %v322_v15 = vand.u32 2147483647, %v318_v11  ;;  %v324_v17 = vand.u32 2147483647, %v320_v13  ;;  %v325_v18 = vand.u32 2147483647, %v321_v14 }
  0x4d   : > { %v338_v23 = vld [vmem:[#allocation2 + $0x8] sm:$0xff] }
  0xbb   : > { %v329_v22 = vpop.permute.xlu0 %328 }
  0xbc   : > { %v331_v24 = vmul.f32 %v329_v22, %v322_v15  ;;  %v332_v25 = vmul.f32 %v329_v22, %v323_v16  ;;  %v333_v26 = vmul.f32 %v329_v22, %v324_v17  ;;  %v334_v27 = vmul.f32 %v329_v22, %v325_v18 }
  0xbe   : > { %v343_v28 = vadd.f32 %v335_v19, %v331_v24  ;;  %v344_v29 = vadd.f32 %v336_v20, %v332_v25  ;;  %v345_v30 = vadd.f32 %v337_v21, %v333_v26  ;;  %v346_v31 = vadd.f32 %v338_v23, %v334_v27 }
  0xbf   : > { %353 = sbr.rel (!%p974_p5) target bundleno = 387 (0x183), region = 48 }
  0xc0   : > { %347 = vst [vmem:[#allocation2 + $0x10] sm:$0xff] %v343_v28 }
  0xc1   : > { %348 = vst [vmem:[#allocation2] sm:$0xff] %v344_v29 }
  0xc2   : > { %349 = vst [vmem:[#allocation2 + $0x18] sm:$0xff] %v345_v30 }
  0xc3   : > { %350 = vst [vmem:[#allocation2 + $0x8] sm:$0xff] %v346_v31 }
  0xc7   : > { %v354_v32 = vld [vmem:[#allocation2 + $0x10] sm:$0xff] }
  0xc8   : > { %v355_v33 = vld [vmem:[#allocation2] sm:$0xff] }
  0xc9   : > { %v356_v34 = vld [vmem:[#allocation2 + $0x18] sm:$0xff]  ;;  %v358_v35 = vadd.f32 %v355_v33, %v354_v32 }
  0xca   : > { %v357_v36 = vld [vmem:[#allocation2 + $0x8] sm:$0xff] }
  0xcb   : > { %v359_v37 = vadd.f32 %v358_v35, %v356_v34 }
  0xcd   : > { %v360_v38 = vadd.f32 %v359_v37, %v357_v36 }
  0xcf   : > { %361 = vadd.xlane.f32.xlu0 %v360_v38 }
 0x142   : > { %v362_v39 = vpop.xlane.xlu0 %361 }
 0x143   : > { %v363_v40 = vrot.slane %v362_v39, 4 }
 0x145   : > { %v364_v41 = vadd.f32 %v363_v40, %v362_v39 }
 0x147   : > { %v365_v42 = vrot.slane %v364_v41, 2 }
 0x149   : > { %v366_v43 = vadd.f32 %v365_v42, %v364_v41 }
 0x14b   : > { %v367_v44 = vrot.slane %v366_v43, 1 }
 0x14d   : > { %v368_v45 = vadd.f32 %v367_v44, %v366_v43 }
 0x14f   : > { %530 = vpush %v368_v45 }
 0x180   : > { %s531_s11 = spop %530 }
 0x181   : > { %v370_v46 = vstv %s531_s11 }
 0x182   : > { %371 = vst [vmem:[%s277_s5] sm:$0xff] %v370_v46 }
 0x183 PF: > { %s536_s6 = scalar_select %p919_p12, [#allocation4], [#allocation11] }
 0x184   : > { %s1078_s24 = smov (!%p919_p12, %s805_s24), 0  ;;  %s388_s16 = sshll.u32 %s277_s5, 4  ;;  %s389_s16 = int_to_ptr.vmem [resolvable:$true] %s388_s16 }
 0x185   : > { %s380_s29 = sld [smem:[%s536_s6 + %s1078_s24]]  ;;  %s373_s9 = scalar_lea.sflag [#allocation7], %s275_s8 }
 0x186   : > { %s721_s22 = scalar_lea.hbm %s1049_s4, 16 }
 0x18b   : > { %s525_s25 = sshll.u32 %s380_s29, 3 }
 0x18c   : > { %s386_s17 = scalar_lea.hbm %s1049_s4, %s525_s25 }
 0x18d   : > { %s390_s30 = sshll.u32 %s386_s17, 4  ;;  %s391_s30 = int_to_ptr.hbm [resolvable:$true] %s390_s30 }
 0x18e   : > { %s715_s10 = sshra.s32 %s391_s30, 4  ;;  %s716_s10 = int_to_ptr.hbm [resolvable:$true] %s715_s10 }
 0x18f   : > { %s717_s14 = scalar_lea.hbm %s716_s10, 8  ;;  %p722_p9 = scmp.lt.s32.totalorder %s716_s10, %s1049_s4 }
 0x190   : > { %p718_p6 = scmp.ne.s32.totalorder %s716_s10, %s717_s14  ;;  %p723_p7 = scmp.lt.s32.totalorder %s721_s22, %s717_s14 }
 0x192   : > { %p719_p8 = pnand %p718_p6, %p919_p12  ;;  %p724_p10 = por %p723_p7, %p722_p9 }
 0x194   : > { %p720_p4 = pneg %p719_p8 }
 0x196   : > { %p725_p11 = pnand %p724_p10, %p720_p4 }
 0x198   : > { %728 = shalt.err (!%p725_p11)
}
 0x199   : > { %538 = dma.vmem_to_hbm [thread:$0]  (%p919_p12), %s389_s16, 128, %s391_s30, %s373_s9  }
 0x19a PF: > { %s402_s8 = sand.u32 1, %s781_s19   ;;  %p548_p1 = pnand %p511_p13, %p924_p0 }
 0x19b   : > { %s403_s5 = scalar_lea.sflag [#allocation7], %s402_s8 }
 0x19c   : > { %p549_p2 = pneg %p548_p1 }
 0x19e   : > { %776 = dma.done.wait (%p549_p2), %s403_s5, 128  }
 0x19f   : > { %778 = vsyncadd (%p549_p2), %s403_s5, 4294967168  ;;  %s31_s26 = sadd.s32 1, %s813_s26   ;;  %s1062_s12 = sld [smem:[#allocation18_spill]] }
 0x1a0   : > { %p28_p3 = scmp.ge.s32.totalorder %s31_s26, 4   ;;  %s1063_s24 = sld [smem:[#allocation16_spill]] }
 0x1a1   : > { %s1064_s25 = sld [smem:[#allocation17_spill]]  ;;  %s1065_s19 = smov %s785_s20 }
 0x1a2   : > { %s1066_s20 = smov %s789_s21  ;;  %s1067_s21 = smov %s932_s18 }
 0x1a3   : > { %s1068_s22 = smov %s797_s0  ;;  %s1069_s0 = smov %s801_s23 }
 0x1a4   :  { %30 = sbr.rel (!%p28_p3) target bundleno = 16 (0x10), region = 101 }
 0x1a5   : > { %s1070_s23 = smov %s1062_s12 }
 0x1a9   :  { %409 = vsyncpa [#allocation6], 1 }
 0x1aa   :  { %411 = vsyncpa [#allocation6 + $0x1], 1 }
 0x1ab   :  { %412 = vsyncpa [#allocation9], 1 }
 0x1ac   :  { %414 = vsyncpa [#allocation9 + $0x1], 1 }
 0x1ad   :  { %415 = vsyncpa [#allocation7], 1 }
 0x1ae   :  { %417 = vsyncpa [#allocation7 + $0x1], 1 }

</bundles_post_ra>
